<compile_context>
chip_gen: v5e
topology: v5e:2x2
jax: 0.10.0
libtpu: 0.0.40
codegen_flags: <defaults>
</compile_context>

<pallas_src>
import jax
import jax.numpy as jnp
from jax.experimental import pallas as pl
from jax.experimental.pallas import tpu as pltpu


def mlp_kernel(x_ref, w1_ref, b1_ref, w2_ref, b2_ref, out_ref):
    # fc1 + bias + ReLU (bias add / max are free VPU filler under MXU slack).
    h = jnp.dot(x_ref[...], w1_ref[...], preferred_element_type=jnp.float32)
    h = jnp.maximum(h + b1_ref[...], 0.0)
    # fc2 + bias.
    o = jnp.dot(h, w2_ref[...], preferred_element_type=jnp.float32) + b2_ref[...]
    # sigmoid(x) = 0.5 * tanh(0.5 * x) + 0.5  -> single EUP op.
    out_ref[...] = (0.5 * jnp.tanh(0.5 * o) + 0.5).astype(out_ref.dtype)


def _default_num_tiles():
    # One grid tile per TensorCore: v5e/v6e have 1 TC per chip, v7x has 2.
    try:
        kind = jax.devices()[0].device_kind.lower()
        if "v7" in kind or "tpu7" in kind:
            return 2
    except Exception:
        pass
    return 1


def prepare_params(w1, b1, w2, b2):
    """One-time parameter prep (hoisted out of the per-call forward path).

    w1: (input, hidden), b1: (hidden,), w2: (hidden, output), b2: (output,).
    """
    return (jnp.asarray(w1, jnp.float32),
            jnp.asarray(b1, jnp.float32).reshape(1, -1),
            jnp.asarray(w2, jnp.float32),
            jnp.asarray(b2, jnp.float32).reshape(1, -1))


def greeting_classifier_forward(x, params, *, num_tiles=None):
    """x: (B, input_size); params from prepare_params. Returns (B, output) f32."""
    w1, b1, w2, b2 = params
    B, D = x.shape
    H = w1.shape[1]
    O = w2.shape[1]

    if num_tiles is None:
        num_tiles = _default_num_tiles()

    # Pad batch so each tile's sublane count is a multiple of 8.
    align = 8 * num_tiles
    Bp = pl.cdiv(B, align) * align
    block_b = Bp // num_tiles

    x32 = jnp.asarray(x, jnp.float32)
    if Bp != B:
        x32 = jnp.pad(x32, ((0, Bp - B), (0, 0)))

    cost = pl.CostEstimate(
        flops=2 * Bp * (D * H + H * O),
        transcendentals=Bp * O,
        bytes_accessed=4 * (Bp * D + D * H + H + H * O + O + Bp * O))

    out = pl.pallas_call(
        mlp_kernel,
        out_shape=jax.ShapeDtypeStruct((Bp, O), jnp.float32),
        grid=(num_tiles,),
        in_specs=[
            # batch tile of activations
            pl.BlockSpec((block_b, D), lambda i: (i, 0)),
            # weights + biases resident across the batch grid (constant maps)
            pl.BlockSpec((D, H), lambda i: (0, 0)),
            pl.BlockSpec((1, H), lambda i: (0, 0)),
            pl.BlockSpec((H, O), lambda i: (0, 0)),
            pl.BlockSpec((1, O), lambda i: (0, 0)),
        ],
        out_specs=pl.BlockSpec((block_b, O), lambda i: (i, 0)),
        compiler_params=pltpu.CompilerParams(
            dimension_semantics=("parallel",)),
        cost_estimate=cost,
    )(x32, w1, b1, w2, b2)

    return out[:B] if Bp != B else out


if __name__ == "__main__":
    # Small model dims consistent with the module.
    B, INPUT, HIDDEN, OUTPUT = 256, 32, 32, 8

    key = jax.random.PRNGKey(0)
    kx, k1, kb1, k2, kb2 = jax.random.split(key, 5)

    x = jax.random.normal(kx, (B, INPUT), dtype=jnp.float32)
    lim1 = 1.0 / (INPUT ** 0.5)
    w1 = jax.random.uniform(k1, (INPUT, HIDDEN), minval=-lim1, maxval=lim1,
                            dtype=jnp.float32)
    b1 = jax.random.uniform(kb1, (HIDDEN,), minval=-lim1, maxval=lim1,
                            dtype=jnp.float32)
    lim2 = 1.0 / (HIDDEN ** 0.5)
    w2 = jax.random.uniform(k2, (HIDDEN, OUTPUT), minval=-lim2, maxval=lim2,
                            dtype=jnp.float32)
    b2 = jax.random.uniform(kb2, (OUTPUT,), minval=-lim2, maxval=lim2,
                            dtype=jnp.float32)

    # Parameter prep happens once, outside the forward path.
    params = prepare_params(w1, b1, w2, b2)

    out = greeting_classifier_forward(x, params)
    out = jax.block_until_ready(out)

    # Pure-JAX reference check.
    ref = jax.nn.sigmoid(jnp.maximum(x @ w1 + b1, 0.0) @ w2 + b2)
    assert out.shape == (B, OUTPUT)
    assert jnp.allclose(out, ref, atol=1e-4, rtol=1e-4), "mismatch vs reference"

    print("KERNEL_OK")
</pallas_src>

<mosaic_0001>
module attributes {stable_mosaic.version = 11 : i64} {
  func.func @mlp_kernel(%arg0: i32, %arg1: memref<256x32xf32, #tpu.memory_space<vmem>>, %arg2: memref<32x32xf32, #tpu.memory_space<vmem>>, %arg3: memref<1x32xf32, #tpu.memory_space<vmem>>, %arg4: memref<32x8xf32, #tpu.memory_space<vmem>>, %arg5: memref<1x8xf32, #tpu.memory_space<vmem>>, %arg6: memref<256x8xf32, #tpu.memory_space<vmem>>) attributes {dimension_semantics = [#tpu.dimension_semantics<parallel>], iteration_bounds = array<i64: 1>, scalar_prefetch = 0 : i64, scratch_operands = 0 : i64, tpu.core_type = #tpu.core_type<tc>, window_params = [{transform_indices = @transform_0, window_bounds = array<i64: 256, 32>}, {pipeline_mode = #tpu.pipeline_mode<synchronous>, transform_indices = @transform_1, window_bounds = array<i64: 32, 32>}, {pipeline_mode = #tpu.pipeline_mode<synchronous>, transform_indices = @transform_2, window_bounds = array<i64: 1, 32>}, {pipeline_mode = #tpu.pipeline_mode<synchronous>, transform_indices = @transform_3, window_bounds = array<i64: 32, 8>}, {pipeline_mode = #tpu.pipeline_mode<synchronous>, transform_indices = @transform_4, window_bounds = array<i64: 1, 8>}, {transform_indices = @transform_5, window_bounds = array<i64: 256, 8>}]} {
    %c0 = arith.constant 0 : index
    %c0_0 = arith.constant 0 : index
    %0 = vector.load %arg1[%c0, %c0_0] : memref<256x32xf32, #tpu.memory_space<vmem>>, vector<256x32xf32>
    %c0_1 = arith.constant 0 : index
    %c0_2 = arith.constant 0 : index
    %1 = vector.load %arg2[%c0_1, %c0_2] : memref<32x32xf32, #tpu.memory_space<vmem>>, vector<32x32xf32>
    %cst = arith.constant dense<0.000000e+00> : vector<256x32xf32>
    %2 = tpu.matmul %0, %1, %cst {dimension_numbers = #tpu.dot_dimension_numbers<[1], [0], [0], [1], [0, 0, 1, 1], [], []>} : vector<256x32xf32>, vector<32x32xf32>, vector<256x32xf32> -> vector<256x32xf32>
    %c0_3 = arith.constant 0 : index
    %c0_4 = arith.constant 0 : index
    %3 = vector.load %arg3[%c0_3, %c0_4] : memref<1x32xf32, #tpu.memory_space<vmem>>, vector<1x32xf32>
    %4 = vector.broadcast %3 : vector<1x32xf32> to vector<256x32xf32>
    %5 = arith.addf %2, %4 : vector<256x32xf32>
    %cst_5 = arith.constant 0.000000e+00 : f32
    %6 = vector.broadcast %cst_5 : f32 to vector<256x32xf32>
    %7 = arith.maximumf %5, %6 : vector<256x32xf32>
    %c0_6 = arith.constant 0 : index
    %c0_7 = arith.constant 0 : index
    %8 = vector.load %arg4[%c0_6, %c0_7] : memref<32x8xf32, #tpu.memory_space<vmem>>, vector<32x8xf32>
    %cst_8 = arith.constant dense<0.000000e+00> : vector<256x8xf32>
    %9 = tpu.matmul %7, %8, %cst_8 {dimension_numbers = #tpu.dot_dimension_numbers<[1], [0], [0], [1], [0, 0, 1, 1], [], []>} : vector<256x32xf32>, vector<32x8xf32>, vector<256x8xf32> -> vector<256x8xf32>
    %c0_9 = arith.constant 0 : index
    %c0_10 = arith.constant 0 : index
    %10 = vector.load %arg5[%c0_9, %c0_10] : memref<1x8xf32, #tpu.memory_space<vmem>>, vector<1x8xf32>
    %11 = vector.broadcast %10 : vector<1x8xf32> to vector<256x8xf32>
    %12 = arith.addf %9, %11 : vector<256x8xf32>
    %cst_11 = arith.constant 5.000000e-01 : f32
    %13 = vector.broadcast %cst_11 : f32 to vector<256x8xf32>
    %14 = arith.mulf %13, %12 : vector<256x8xf32>
    %15 = math.tanh %14 : vector<256x8xf32>
    %cst_12 = arith.constant 5.000000e-01 : f32
    %16 = vector.broadcast %cst_12 : f32 to vector<256x8xf32>
    %17 = arith.mulf %16, %15 : vector<256x8xf32>
    %cst_13 = arith.constant 5.000000e-01 : f32
    %18 = vector.broadcast %cst_13 : f32 to vector<256x8xf32>
    %19 = arith.addf %17, %18 : vector<256x8xf32>
    %c0_14 = arith.constant 0 : index
    %c0_15 = arith.constant 0 : index
    %20 = vector.load %arg6[%c0_14, %c0_15] : memref<256x8xf32, #tpu.memory_space<vmem>>, vector<256x8xf32>
    tpu.vector_store %arg6[%c0_14, %c0_15], %19 {strides = array<i32>} : memref<256x8xf32, #tpu.memory_space<vmem>>, vector<256x8xf32>,
    return
  }
  func.func @transform_0(%arg0: i32) -> (i32, i32) {
    %c0_i32 = arith.constant 0 : i32
    %c0_i32_0 = arith.constant 0 : i32
    return %arg0, %c0_i32 : i32, i32
  }
  func.func @transform_1(%arg0: i32) -> (i32, i32) {
    %c0_i32 = arith.constant 0 : i32
    %c0_i32_0 = arith.constant 0 : i32
    %c0_i32_1 = arith.constant 0 : i32
    return %c0_i32, %c0_i32_0 : i32, i32
  }
  func.func @transform_2(%arg0: i32) -> (i32, i32) {
    %c0_i32 = arith.constant 0 : i32
    %c0_i32_0 = arith.constant 0 : i32
    %c0_i32_1 = arith.constant 0 : i32
    return %c0_i32, %c0_i32_0 : i32, i32
  }
  func.func @transform_3(%arg0: i32) -> (i32, i32) {
    %c0_i32 = arith.constant 0 : i32
    %c0_i32_0 = arith.constant 0 : i32
    %c0_i32_1 = arith.constant 0 : i32
    return %c0_i32, %c0_i32_0 : i32, i32
  }
  func.func @transform_4(%arg0: i32) -> (i32, i32) {
    %c0_i32 = arith.constant 0 : i32
    %c0_i32_0 = arith.constant 0 : i32
    %c0_i32_1 = arith.constant 0 : i32
    return %c0_i32, %c0_i32_0 : i32, i32
  }
  func.func @transform_5(%arg0: i32) -> (i32, i32) {
    %c0_i32 = arith.constant 0 : i32
    %c0_i32_0 = arith.constant 0 : i32
    return %arg0, %c0_i32 : i32, i32
  }
}

</mosaic_0001>

<bundles_post_ra>
// kernel: tpu_custom_call.1
= control target key start
LH: loop header
LB: loop body
LE: loop exit
PB: predicated region body
PF: predicated region fallthrough
CT: control target
= control target key end

     0   :  { %vm60_vm0 = vcmask 261120   ;;  %vm647_vm1 = vcmask 64512   ;;  %s1238_s1 = inlined_call_operand.vmem [shape: f32[32,32], index: 1, kind: input, shape index: {}]   ;;  %s1239_s0 = inlined_call_operand.vmem [shape: f32[256,32], index: 0, kind: input, shape index: {}]   ;;  %s1240_s2 = inlined_call_operand.vmem [shape: f32[1,32], index: 2, kind: input, shape index: {}]   ;;  %s1241_s3 = inlined_call_operand.vmem [shape: f32[32,8], index: 3, kind: input, shape index: {}]   ;;  %s1242_s4 = inlined_call_operand.vmem [shape: f32[1,8], index: 4, kind: input, shape index: {}]   ;;  %s1243_s5 = inlined_call_operand.vmem [shape: f32[256,8], index: 5, kind: output, shape index: {}]  }
   0x1   :  { %v55_v0 = vld [vmem:[%s1238_s1 + $0x18] sm:$0xff]  ;;  %v54_v1 = vld [vmem:[%s1238_s1 + $0x10] sm:$0xff]  ;;  %v53_v2 = vld [vmem:[%s1238_s1 + $0x8] sm:$0xff] }
   0x2   :  { %748 = vmatpush.msra.mxu2 %v55_v0  ;;  %169 = vmatpush.msra.mxu0 %v55_v0  ;;  %v52_v3 = vld [vmem:[%s1238_s1] sm:$0xff]  ;;  %v37_v6 = vld [vmem:[%s1239_s0 + $0x88] sm:$0xff]  ;;  %v38_v8 = vld [vmem:[%s1239_s0 + $0x90] sm:$0xff] }
   0x3   :  { %v36_v4 = vld [vmem:[%s1239_s0 + $0x80] sm:$0xff]  ;;  %v21_v7 = vld [vmem:[%s1239_s0 + $0x8] sm:$0xff]  ;;  %v22_v9 = vld [vmem:[%s1239_s0 + $0x10] sm:$0xff] }
   0x4   :  { %749 = vmatpush.msra.mxu2 %v54_v1  ;;  %170 = vmatpush.msra.mxu0 %v54_v1  ;;  %v20_v5 = vld [vmem:[%s1239_s0] sm:$0xff]  ;;  %v39_v10 = vld [vmem:[%s1239_s0 + $0x98] sm:$0xff]  ;;  %v41_v14 = vld [vmem:[%s1239_s0 + $0xa8] sm:$0xff] }
   0x5   :  { %v23_v11 = vld [vmem:[%s1239_s0 + $0x18] sm:$0xff]  ;;  %v40_v12 = vld [vmem:[%s1239_s0 + $0xa0] sm:$0xff]  ;;  %v25_v15 = vld [vmem:[%s1239_s0 + $0x28] sm:$0xff] }
   0x6   :  { %750 = vmatpush.msra.mxu2 %v53_v2  ;;  %171 = vmatpush.msra.mxu0 %v53_v2  ;;  %v24_v13 = vld [vmem:[%s1239_s0 + $0x20] sm:$0xff]  ;;  %v42_v16 = vld [vmem:[%s1239_s0 + $0xb0] sm:$0xff]  ;;  %v43_v18 = vld [vmem:[%s1239_s0 + $0xb8] sm:$0xff] }
   0x7   :  { %v26_v17 = vld [vmem:[%s1239_s0 + $0x30] sm:$0xff]  ;;  %v27_v19 = vld [vmem:[%s1239_s0 + $0x38] sm:$0xff]  ;;  %v44_v20 = vld [vmem:[%s1239_s0 + $0xc0] sm:$0xff] }
   0x8   :  { %751 = vmatpush.msra.mxu2 %v52_v3  ;;  %172 = vmatpush.msra.mxu0 %v52_v3  ;;  %v28_v21 = vld [vmem:[%s1239_s0 + $0x40] sm:$0xff]  ;;  %v45_v22 = vld [vmem:[%s1239_s0 + $0xc8] sm:$0xff]  ;;  %v46_v24 = vld [vmem:[%s1239_s0 + $0xd0] sm:$0xff] }
   0x9   :  { %700 = vmatmul.msk.f32.vlgmr.msra.gmra.mxu2 %vm60_vm0, %v36_v4  ;;  %684 = vmatmul.msk.f32.vlgmr.msra.gmra.mxu0 %vm60_vm0, %v20_v5  ;;  %v29_v23 = vld [vmem:[%s1239_s0 + $0x48] sm:$0xff]  ;;  %v30_v25 = vld [vmem:[%s1239_s0 + $0x50] sm:$0xff]  ;;  %v47_v26 = vld [vmem:[%s1239_s0 + $0xd8] sm:$0xff] }
   0xa   :  { %v31_v27 = vld [vmem:[%s1239_s0 + $0x58] sm:$0xff]  ;;  %v48_v29 = vld [vmem:[%s1239_s0 + $0xe0] sm:$0xff]  ;;  %v304_v31 = vld [vmem:[%s1241_s3 + $0x10] sm:$0xff] }
   0xb   :  { %v305_v28 = vld [vmem:[%s1241_s3 + $0x18] sm:$0xff]  ;;  %v32_v30 = vld [vmem:[%s1239_s0 + $0x60] sm:$0xff]  ;;  %v303_v32 = vld [vmem:[%s1241_s3 + $0x8] sm:$0xff] }
   0xc   :  { %752 = vmatpush.msra.mxu3 %v305_v28  ;;  %418 = vmatpush.msra.mxu1 %v305_v28  ;;  %v49_v33 = vld [vmem:[%s1239_s0 + $0xe8] sm:$0xff]  ;;  %v302_v35 = vld [vmem:[%s1241_s3] sm:$0xff]  ;;  %v50_v36 = vld [vmem:[%s1239_s0 + $0xf0] sm:$0xff] }
   0xd   :  { %v33_v34 = vld [vmem:[%s1239_s0 + $0x68] sm:$0xff]  ;;  %v34_v37 = vld [vmem:[%s1239_s0 + $0x70] sm:$0xff]  ;;  %v51_v38 = vld [vmem:[%s1239_s0 + $0xf8] sm:$0xff] }
   0xe   :  { %753 = vmatpush.msra.mxu3 %v304_v31  ;;  %419 = vmatpush.msra.mxu1 %v304_v31  ;;  %v35_v39 = vld [vmem:[%s1239_s0 + $0x78] sm:$0xff]  ;;  %v1007_v40 = vld [vmem:[%s1240_s2] ss:$0 sm:$0xff] }
  0x10   :  { %754 = vmatpush.msra.mxu3 %v303_v32  ;;  %420 = vmatpush.msra.mxu1 %v303_v32 }
  0x11   :  { %701 = vmatmul.msk.f32.gmra.mxu2 %vm60_vm0, %v37_v6  ;;  %685 = vmatmul.msk.f32.gmra.mxu0 %vm60_vm0, %v21_v7 }
  0x12   :  { %755 = vmatpush.msra.mxu3 %v302_v35  ;;  %421 = vmatpush.msra.mxu1 %v302_v35 }
  0x19   :  { %702 = vmatmul.msk.f32.gmra.mxu2 %vm60_vm0, %v38_v8  ;;  %686 = vmatmul.msk.f32.gmra.mxu0 %vm60_vm0, %v22_v9 }
  0x21   :  { %703 = vmatmul.msk.f32.gmra.mxu2 %vm60_vm0, %v39_v10  ;;  %687 = vmatmul.msk.f32.gmra.mxu0 %vm60_vm0, %v23_v11 }
  0x29   :  { %704 = vmatmul.msk.f32.gmra.mxu2 %vm60_vm0, %v40_v12  ;;  %688 = vmatmul.msk.f32.gmra.mxu0 %vm60_vm0, %v24_v13 }
  0x31   :  { %705 = vmatmul.msk.f32.gmra.mxu2 %vm60_vm0, %v41_v14  ;;  %689 = vmatmul.msk.f32.gmra.mxu0 %vm60_vm0, %v25_v15 }
  0x39   :  { %706 = vmatmul.msk.f32.gmra.mxu2 %vm60_vm0, %v42_v16  ;;  %690 = vmatmul.msk.f32.gmra.mxu0 %vm60_vm0, %v26_v17 }
  0x41   :  { %707 = vmatmul.msk.f32.gmra.mxu2 %vm60_vm0, %v43_v18  ;;  %691 = vmatmul.msk.f32.gmra.mxu0 %vm60_vm0, %v27_v19 }
  0x49   :  { %708 = vmatmul.msk.f32.gmra.mxu2 %vm60_vm0, %v44_v20  ;;  %692 = vmatmul.msk.f32.gmra.mxu0 %vm60_vm0, %v28_v21 }
  0x51   :  { %709 = vmatmul.msk.f32.gmra.mxu2 %vm60_vm0, %v45_v22  ;;  %693 = vmatmul.msk.f32.gmra.mxu0 %vm60_vm0, %v29_v23 }
  0x59   :  { %710 = vmatmul.msk.f32.gmra.mxu2 %vm60_vm0, %v46_v24  ;;  %694 = vmatmul.msk.f32.gmra.mxu0 %vm60_vm0, %v30_v25 }
  0x61   :  { %711 = vmatmul.msk.f32.gmra.mxu2 %vm60_vm0, %v47_v26  ;;  %695 = vmatmul.msk.f32.gmra.mxu0 %vm60_vm0, %v31_v27 }
  0x69   :  { %712 = vmatmul.msk.f32.gmra.mxu2 %vm60_vm0, %v48_v29  ;;  %696 = vmatmul.msk.f32.gmra.mxu0 %vm60_vm0, %v32_v30 }
  0x71   :  { %713 = vmatmul.msk.f32.gmra.mxu2 %vm60_vm0, %v49_v33  ;;  %697 = vmatmul.msk.f32.gmra.mxu0 %vm60_vm0, %v33_v34 }
  0x79   :  { %714 = vmatmul.msk.f32.gmra.mxu2 %vm60_vm0, %v50_v36  ;;  %698 = vmatmul.msk.f32.gmra.mxu0 %vm60_vm0, %v34_v37 }
  0x81   :  { %715 = vmatmul.msk.f32.gmra.mxu2 %vm60_vm0, %v51_v38  ;;  %699 = vmatmul.msk.f32.gmra.mxu0 %vm60_vm0, %v35_v39 }
  0x86   :  { %v174_v41 = vpop.f32.mrf.mxu0 }
  0x87   :  { %v175_v42 = vadd.f32 %v1007_v40, %v174_v41 }
  0x89   :  { %v270_v43 = vmax.f32 %v175_v42, 0.0 }
  0x8b   :  { %716 = vmatmul.msk.f32.vlgmr.msra.gmra.mxu1 %vm60_vm0, %v270_v43 }
  0x8c   :  { %v222_v44 = vpop.f32.mrf.mxu2 }
  0x8d   :  { %v223_v45 = vadd.f32 %v1007_v40, %v222_v44 }
  0x8e   :  { %v177_v46 = vpop.f32.mrf.mxu0 }
  0x8f   :  { %v286_v47 = vmax.f32 %v223_v45, 0.0  ;;  %v178_v48 = vadd.f32 %v1007_v40, %v177_v46 }
  0x91   :  { %732 = vmatmul.msk.f32.vlgmr.msra.gmra.mxu3 %vm60_vm0, %v286_v47  ;;  %v271_v49 = vmax.f32 %v178_v48, 0.0 }
  0x93   :  { %717 = vmatmul.msk.f32.gmra.mxu1 %vm60_vm0, %v271_v49 }
  0x94   :  { %v225_v50 = vpop.f32.mrf.mxu2 }
  0x95   :  { %v226_v51 = vadd.f32 %v1007_v40, %v225_v50 }
  0x96   :  { %v180_v52 = vpop.f32.mrf.mxu0 }
  0x97   :  { %v287_v53 = vmax.f32 %v226_v51, 0.0  ;;  %v181_v54 = vadd.f32 %v1007_v40, %v180_v52 }
  0x99   :  { %733 = vmatmul.msk.f32.gmra.mxu3 %vm60_vm0, %v287_v53  ;;  %v272_v55 = vmax.f32 %v181_v54, 0.0 }
  0x9b   :  { %718 = vmatmul.msk.f32.gmra.mxu1 %vm60_vm0, %v272_v55 }
  0x9c   :  { %v228_v56 = vpop.f32.mrf.mxu2 }
  0x9d   :  { %v229_v57 = vadd.f32 %v1007_v40, %v228_v56 }
  0x9e   :  { %v183_v58 = vpop.f32.mrf.mxu0 }
  0x9f   :  { %v288_v59 = vmax.f32 %v229_v57, 0.0  ;;  %v184_v60 = vadd.f32 %v1007_v40, %v183_v58 }
  0xa1   :  { %734 = vmatmul.msk.f32.gmra.mxu3 %vm60_vm0, %v288_v59  ;;  %v273_v61 = vmax.f32 %v184_v60, 0.0 }
  0xa3   :  { %719 = vmatmul.msk.f32.gmra.mxu1 %vm60_vm0, %v273_v61 }
  0xa4   :  { %v231_v62 = vpop.f32.mrf.mxu2 }
  0xa5   :  { %v232_v63 = vadd.f32 %v1007_v40, %v231_v62 }
  0xa6   :  { %v186_v0 = vpop.f32.mrf.mxu0 }
  0xa7   :  { %v289_v1 = vmax.f32 %v232_v63, 0.0  ;;  %v187_v2 = vadd.f32 %v1007_v40, %v186_v0 }
  0xa9   :  { %735 = vmatmul.msk.f32.gmra.mxu3 %vm60_vm0, %v289_v1  ;;  %v274_v3 = vmax.f32 %v187_v2, 0.0 }
  0xab   :  { %720 = vmatmul.msk.f32.gmra.mxu1 %vm60_vm0, %v274_v3 }
  0xac   :  { %v234_v4 = vpop.f32.mrf.mxu2 }
  0xad   :  { %v235_v5 = vadd.f32 %v1007_v40, %v234_v4 }
  0xae   :  { %v189_v6 = vpop.f32.mrf.mxu0 }
  0xaf   :  { %v290_v7 = vmax.f32 %v235_v5, 0.0  ;;  %v190_v8 = vadd.f32 %v1007_v40, %v189_v6 }
  0xb1   :  { %736 = vmatmul.msk.f32.gmra.mxu3 %vm60_vm0, %v290_v7  ;;  %v275_v9 = vmax.f32 %v190_v8, 0.0 }
  0xb3   :  { %721 = vmatmul.msk.f32.gmra.mxu1 %vm60_vm0, %v275_v9  ;;  %v1075_v9 = vld [vmem:[%s1242_s4] ss:$0 sm:$0xff] }
  0xb4   :  { %v237_v10 = vpop.f32.mrf.mxu2 }
  0xb5   :  { %v238_v11 = vadd.f32 %v1007_v40, %v237_v10 }
  0xb6   :  { %v192_v12 = vpop.f32.mrf.mxu0 }
  0xb7   :  { %v291_v13 = vmax.f32 %v238_v11, 0.0  ;;  %v193_v14 = vadd.f32 %v1007_v40, %v192_v12 }
  0xb9   :  { %737 = vmatmul.msk.f32.gmra.mxu3 %vm60_vm0, %v291_v13  ;;  %v276_v15 = vmax.f32 %v193_v14, 0.0 }
  0xbb   :  { %722 = vmatmul.msk.f32.gmra.mxu1 %vm60_vm0, %v276_v15 }
  0xbc   :  { %v240_v16 = vpop.f32.mrf.mxu2 }
  0xbd   :  { %v241_v17 = vadd.f32 %v1007_v40, %v240_v16 }
  0xbe   :  { %v195_v18 = vpop.f32.mrf.mxu0 }
  0xbf   :  { %v292_v19 = vmax.f32 %v241_v17, 0.0  ;;  %v196_v20 = vadd.f32 %v1007_v40, %v195_v18 }
  0xc1   :  { %738 = vmatmul.msk.f32.gmra.mxu3 %vm60_vm0, %v292_v19  ;;  %v277_v21 = vmax.f32 %v196_v20, 0.0 }
  0xc3   :  { %723 = vmatmul.msk.f32.gmra.mxu1 %vm60_vm0, %v277_v21 }
  0xc4   :  { %v243_v22 = vpop.f32.mrf.mxu2 }
  0xc5   :  { %v244_v23 = vadd.f32 %v1007_v40, %v243_v22 }
  0xc6   :  { %v198_v24 = vpop.f32.mrf.mxu0 }
  0xc7   :  { %v293_v25 = vmax.f32 %v244_v23, 0.0  ;;  %v199_v26 = vadd.f32 %v1007_v40, %v198_v24 }
  0xc9   :  { %739 = vmatmul.msk.f32.gmra.mxu3 %vm60_vm0, %v293_v25  ;;  %v278_v27 = vmax.f32 %v199_v26, 0.0 }
  0xcb   :  { %724 = vmatmul.msk.f32.gmra.mxu1 %vm60_vm0, %v278_v27 }
  0xcc   :  { %v246_v28 = vpop.f32.mrf.mxu2 }
  0xcd   :  { %v247_v29 = vadd.f32 %v1007_v40, %v246_v28 }
  0xce   :  { %v201_v30 = vpop.f32.mrf.mxu0 }
  0xcf   :  { %v294_v31 = vmax.f32 %v247_v29, 0.0  ;;  %v202_v32 = vadd.f32 %v1007_v40, %v201_v30 }
  0xd1   :  { %740 = vmatmul.msk.f32.gmra.mxu3 %vm60_vm0, %v294_v31  ;;  %v279_v33 = vmax.f32 %v202_v32, 0.0 }
  0xd3   :  { %725 = vmatmul.msk.f32.gmra.mxu1 %vm60_vm0, %v279_v33 }
  0xd4   :  { %v249_v34 = vpop.f32.mrf.mxu2 }
  0xd5   :  { %v250_v35 = vadd.f32 %v1007_v40, %v249_v34 }
  0xd6   :  { %v204_v36 = vpop.f32.mrf.mxu0 }
  0xd7   :  { %v295_v37 = vmax.f32 %v250_v35, 0.0  ;;  %v205_v38 = vadd.f32 %v1007_v40, %v204_v36 }
  0xd9   :  { %741 = vmatmul.msk.f32.gmra.mxu3 %vm60_vm0, %v295_v37  ;;  %v280_v39 = vmax.f32 %v205_v38, 0.0 }
  0xdb   :  { %726 = vmatmul.msk.f32.gmra.mxu1 %vm60_vm0, %v280_v39 }
  0xdc   :  { %v252_v41 = vpop.f32.mrf.mxu2 }
  0xdd   :  { %v253_v42 = vadd.f32 %v1007_v40, %v252_v41 }
  0xde   :  { %v207_v43 = vpop.f32.mrf.mxu0 }
  0xdf   :  { %v296_v44 = vmax.f32 %v253_v42, 0.0  ;;  %v208_v45 = vadd.f32 %v1007_v40, %v207_v43 }
  0xe1   :  { %742 = vmatmul.msk.f32.gmra.mxu3 %vm60_vm0, %v296_v44  ;;  %v281_v46 = vmax.f32 %v208_v45, 0.0 }
  0xe3   :  { %727 = vmatmul.msk.f32.gmra.mxu1 %vm60_vm0, %v281_v46 }
  0xe4   :  { %v255_v47 = vpop.f32.mrf.mxu2 }
  0xe5   :  { %v256_v48 = vadd.f32 %v1007_v40, %v255_v47 }
  0xe6   :  { %v210_v49 = vpop.f32.mrf.mxu0 }
  0xe7   :  { %v297_v50 = vmax.f32 %v256_v48, 0.0  ;;  %v211_v51 = vadd.f32 %v1007_v40, %v210_v49 }
  0xe9   :  { %743 = vmatmul.msk.f32.gmra.mxu3 %vm60_vm0, %v297_v50  ;;  %v282_v52 = vmax.f32 %v211_v51, 0.0 }
  0xeb   :  { %728 = vmatmul.msk.f32.gmra.mxu1 %vm60_vm0, %v282_v52 }
  0xec   :  { %v258_v53 = vpop.f32.mrf.mxu2 }
  0xed   :  { %v259_v54 = vadd.f32 %v1007_v40, %v258_v53 }
  0xee   :  { %v213_v55 = vpop.f32.mrf.mxu0 }
  0xef   :  { %v298_v56 = vmax.f32 %v259_v54, 0.0  ;;  %v214_v57 = vadd.f32 %v1007_v40, %v213_v55 }
  0xf1   :  { %744 = vmatmul.msk.f32.gmra.mxu3 %vm60_vm0, %v298_v56  ;;  %v283_v58 = vmax.f32 %v214_v57, 0.0 }
  0xf3   :  { %729 = vmatmul.msk.f32.gmra.mxu1 %vm60_vm0, %v283_v58 }
  0xf4   :  { %v261_v59 = vpop.f32.mrf.mxu2 }
  0xf5   :  { %v262_v60 = vadd.f32 %v1007_v40, %v261_v59 }
  0xf6   :  { %v216_v61 = vpop.f32.mrf.mxu0 }
  0xf7   :  { %v299_v62 = vmax.f32 %v262_v60, 0.0  ;;  %v217_v63 = vadd.f32 %v1007_v40, %v216_v61 }
  0xf9   :  { %745 = vmatmul.msk.f32.gmra.mxu3 %vm60_vm0, %v299_v62  ;;  %v284_v0 = vmax.f32 %v217_v63, 0.0 }
  0xfb   :  { %730 = vmatmul.msk.f32.gmra.mxu1 %vm60_vm0, %v284_v0 }
  0xfc   :  { %v264_v1 = vpop.f32.mrf.mxu2 }
  0xfd   :  { %v265_v2 = vadd.f32 %v1007_v40, %v264_v1 }
  0xfe   :  { %v219_v3 = vpop.f32.mrf.mxu0 }
  0xff   :  { %v300_v4 = vmax.f32 %v265_v2, 0.0  ;;  %v220_v5 = vadd.f32 %v1007_v40, %v219_v3 }
 0x101   :  { %746 = vmatmul.msk.f32.gmra.mxu3 %vm60_vm0, %v300_v4  ;;  %v285_v6 = vmax.f32 %v220_v5, 0.0 }
 0x103   :  { %731 = vmatmul.msk.f32.gmra.mxu1 %vm60_vm0, %v285_v6 }
 0x104   :  { %v267_v7 = vpop.f32.mrf.mxu2 }
 0x105   :  { %v268_v8 = vadd.f32 %v1007_v40, %v267_v7 }
 0x107   :  { %v301_v10 = vmax.f32 %v268_v8, 0.0 }
 0x108   :  { %v423_v11 = vpop.f32.mrf.mxu1 }
 0x109   :  { %747 = vmatmul.msk.f32.gmra.mxu3 %vm60_vm0, %v301_v10  ;;  %v424_v12 = vadd.f32 %v1075_v9, %v423_v11 }
 0x10b   :  { %v519_v13 = vmul.f32 0.5, %v424_v12 }
 0x10d   :  { %758 = vtanh.f32 %v519_v13 }
 0x110   :  { %v426_v14 = vpop.f32.mrf.mxu1 }
 0x111   :  { %v427_v15 = vadd.f32 %v1075_v9, %v426_v14 }
 0x113   :  { %v759_v16 = vpop.eup %758  ;;  %v520_v17 = vmul.f32 0.5, %v427_v15 }
 0x114   :  { %v583_v18 = vmul.f32 0.5, %v759_v16  ;;  %v471_v40 = vpop.f32.mrf.mxu3 }
 0x115   :  { %v472_v19 = vadd.f32 %v1075_v9, %v471_v40  ;;  %760 = vtanh.f32 %v520_v17 }
 0x116   :  { %v615_v20 = vadd.f32 0.5, %v583_v18 }
 0x117   :  { %v535_v21 = vmul.f32 0.5, %v472_v19 }
 0x118   :  { %648 = vst.msk [vmem:[%s1243_s5] sm:$0xff] %vm647_vm1, %v615_v20  ;;  %v429_v22 = vpop.f32.mrf.mxu1 }
 0x119   :  { %762 = vtanh.f32 %v535_v21  ;;  %v430_v23 = vadd.f32 %v1075_v9, %v429_v22 }
 0x11b   :  { %v761_v24 = vpop.eup %760  ;;  %v521_v25 = vmul.f32 0.5, %v430_v23 }
 0x11c   :  { %v584_v26 = vmul.f32 0.5, %v761_v24  ;;  %v474_v27 = vpop.f32.mrf.mxu3 }
 0x11d   :  { %v475_v28 = vadd.f32 %v1075_v9, %v474_v27  ;;  %764 = vtanh.f32 %v521_v25 }
 0x11e   :  { %v616_v29 = vadd.f32 0.5, %v584_v26 }
 0x11f   :  { %v763_v30 = vpop.eup %762  ;;  %v536_v31 = vmul.f32 0.5, %v475_v28 }
 0x120   :  { %v599_v32 = vmul.f32 0.5, %v763_v30  ;;  %649 = vst.msk [vmem:[%s1243_s5 + $0x8] sm:$0xff] %vm647_vm1, %v616_v29  ;;  %v432_v33 = vpop.f32.mrf.mxu1 }
 0x121   :  { %766 = vtanh.f32 %v536_v31  ;;  %v433_v34 = vadd.f32 %v1075_v9, %v432_v33 }
 0x122   :  { %v631_v35 = vadd.f32 0.5, %v599_v32 }
 0x123   :  { %v765_v36 = vpop.eup %764  ;;  %v522_v37 = vmul.f32 0.5, %v433_v34 }
 0x124   :  { %664 = vst.msk [vmem:[%s1243_s5 + $0x80] sm:$0xff] %vm647_vm1, %v631_v35  ;;  %v585_v38 = vmul.f32 0.5, %v765_v36  ;;  %v477_v39 = vpop.f32.mrf.mxu3 }
 0x125   :  { %v478_v41 = vadd.f32 %v1075_v9, %v477_v39  ;;  %768 = vtanh.f32 %v522_v37 }
 0x126   :  { %v617_v42 = vadd.f32 0.5, %v585_v38 }
 0x127   :  { %v767_v43 = vpop.eup %766  ;;  %v537_v44 = vmul.f32 0.5, %v478_v41 }
 0x128   :  { %v600_v45 = vmul.f32 0.5, %v767_v43  ;;  %650 = vst.msk [vmem:[%s1243_s5 + $0x10] sm:$0xff] %vm647_vm1, %v617_v42  ;;  %v435_v46 = vpop.f32.mrf.mxu1 }
 0x129   :  { %770 = vtanh.f32 %v537_v44  ;;  %v436_v47 = vadd.f32 %v1075_v9, %v435_v46 }
 0x12a   :  { %v632_v48 = vadd.f32 0.5, %v600_v45 }
 0x12b   :  { %v769_v49 = vpop.eup %768  ;;  %v523_v50 = vmul.f32 0.5, %v436_v47 }
 0x12c   :  { %665 = vst.msk [vmem:[%s1243_s5 + $0x88] sm:$0xff] %vm647_vm1, %v632_v48  ;;  %v586_v51 = vmul.f32 0.5, %v769_v49  ;;  %v480_v52 = vpop.f32.mrf.mxu3 }
 0x12d   :  { %v481_v53 = vadd.f32 %v1075_v9, %v480_v52  ;;  %772 = vtanh.f32 %v523_v50 }
 0x12e   :  { %v618_v54 = vadd.f32 0.5, %v586_v51 }
 0x12f   :  { %v771_v55 = vpop.eup %770  ;;  %v538_v56 = vmul.f32 0.5, %v481_v53 }
 0x130   :  { %v601_v57 = vmul.f32 0.5, %v771_v55  ;;  %651 = vst.msk [vmem:[%s1243_s5 + $0x18] sm:$0xff] %vm647_vm1, %v618_v54  ;;  %v438_v58 = vpop.f32.mrf.mxu1 }
 0x131   :  { %774 = vtanh.f32 %v538_v56  ;;  %v439_v59 = vadd.f32 %v1075_v9, %v438_v58 }
 0x132   :  { %v633_v60 = vadd.f32 0.5, %v601_v57 }
 0x133   :  { %v773_v61 = vpop.eup %772  ;;  %v524_v62 = vmul.f32 0.5, %v439_v59 }
 0x134   :  { %666 = vst.msk [vmem:[%s1243_s5 + $0x90] sm:$0xff] %vm647_vm1, %v633_v60  ;;  %v587_v63 = vmul.f32 0.5, %v773_v61  ;;  %v483_v0 = vpop.f32.mrf.mxu3 }
 0x135   :  { %v484_v1 = vadd.f32 %v1075_v9, %v483_v0  ;;  %776 = vtanh.f32 %v524_v62 }
 0x136   :  { %v619_v2 = vadd.f32 0.5, %v587_v63 }
 0x137   :  { %v775_v3 = vpop.eup %774  ;;  %v539_v4 = vmul.f32 0.5, %v484_v1 }
 0x138   :  { %v602_v5 = vmul.f32 0.5, %v775_v3  ;;  %652 = vst.msk [vmem:[%s1243_s5 + $0x20] sm:$0xff] %vm647_vm1, %v619_v2  ;;  %v441_v6 = vpop.f32.mrf.mxu1 }
 0x139   :  { %778 = vtanh.f32 %v539_v4  ;;  %v442_v7 = vadd.f32 %v1075_v9, %v441_v6 }
 0x13a   :  { %v634_v8 = vadd.f32 0.5, %v602_v5 }
 0x13b   :  { %v777_v10 = vpop.eup %776  ;;  %v525_v11 = vmul.f32 0.5, %v442_v7 }
 0x13c   :  { %667 = vst.msk [vmem:[%s1243_s5 + $0x98] sm:$0xff] %vm647_vm1, %v634_v8  ;;  %v588_v12 = vmul.f32 0.5, %v777_v10  ;;  %v486_v13 = vpop.f32.mrf.mxu3 }
 0x13d   :  { %v487_v14 = vadd.f32 %v1075_v9, %v486_v13  ;;  %780 = vtanh.f32 %v525_v11 }
 0x13e   :  { %v620_v15 = vadd.f32 0.5, %v588_v12 }
 0x13f   :  { %v779_v16 = vpop.eup %778  ;;  %v540_v17 = vmul.f32 0.5, %v487_v14 }
 0x140   :  { %v603_v18 = vmul.f32 0.5, %v779_v16  ;;  %653 = vst.msk [vmem:[%s1243_s5 + $0x28] sm:$0xff] %vm647_vm1, %v620_v15  ;;  %v444_v40 = vpop.f32.mrf.mxu1 }
 0x141   :  { %782 = vtanh.f32 %v540_v17  ;;  %v445_v19 = vadd.f32 %v1075_v9, %v444_v40 }
 0x142   :  { %v635_v20 = vadd.f32 0.5, %v603_v18 }
 0x143   :  { %v781_v21 = vpop.eup %780  ;;  %v526_v22 = vmul.f32 0.5, %v445_v19 }
 0x144   :  { %668 = vst.msk [vmem:[%s1243_s5 + $0xa0] sm:$0xff] %vm647_vm1, %v635_v20  ;;  %v589_v23 = vmul.f32 0.5, %v781_v21  ;;  %v489_v24 = vpop.f32.mrf.mxu3 }
 0x145   :  { %v490_v25 = vadd.f32 %v1075_v9, %v489_v24  ;;  %784 = vtanh.f32 %v526_v22 }
 0x146   :  { %v621_v26 = vadd.f32 0.5, %v589_v23 }
 0x147   :  { %v783_v27 = vpop.eup %782  ;;  %v541_v28 = vmul.f32 0.5, %v490_v25 }
 0x148   :  { %v604_v29 = vmul.f32 0.5, %v783_v27  ;;  %654 = vst.msk [vmem:[%s1243_s5 + $0x30] sm:$0xff] %vm647_vm1, %v621_v26  ;;  %v447_v30 = vpop.f32.mrf.mxu1 }
 0x149   :  { %786 = vtanh.f32 %v541_v28  ;;  %v448_v31 = vadd.f32 %v1075_v9, %v447_v30 }
 0x14a   :  { %v636_v32 = vadd.f32 0.5, %v604_v29 }
 0x14b   :  { %v785_v33 = vpop.eup %784  ;;  %v527_v34 = vmul.f32 0.5, %v448_v31 }
 0x14c   :  { %669 = vst.msk [vmem:[%s1243_s5 + $0xa8] sm:$0xff] %vm647_vm1, %v636_v32  ;;  %v590_v35 = vmul.f32 0.5, %v785_v33  ;;  %v492_v36 = vpop.f32.mrf.mxu3 }
 0x14d   :  { %v493_v37 = vadd.f32 %v1075_v9, %v492_v36  ;;  %788 = vtanh.f32 %v527_v34 }
 0x14e   :  { %v622_v38 = vadd.f32 0.5, %v590_v35 }
 0x14f   :  { %v787_v39 = vpop.eup %786  ;;  %v542_v41 = vmul.f32 0.5, %v493_v37 }
 0x150   :  { %v605_v42 = vmul.f32 0.5, %v787_v39  ;;  %655 = vst.msk [vmem:[%s1243_s5 + $0x38] sm:$0xff] %vm647_vm1, %v622_v38  ;;  %v450_v43 = vpop.f32.mrf.mxu1 }
 0x151   :  { %790 = vtanh.f32 %v542_v41  ;;  %v451_v44 = vadd.f32 %v1075_v9, %v450_v43 }
 0x152   :  { %v637_v45 = vadd.f32 0.5, %v605_v42 }
 0x153   :  { %v789_v46 = vpop.eup %788  ;;  %v528_v47 = vmul.f32 0.5, %v451_v44 }
 0x154   :  { %670 = vst.msk [vmem:[%s1243_s5 + $0xb0] sm:$0xff] %vm647_vm1, %v637_v45  ;;  %v591_v48 = vmul.f32 0.5, %v789_v46  ;;  %v495_v49 = vpop.f32.mrf.mxu3 }
 0x155   :  { %v496_v50 = vadd.f32 %v1075_v9, %v495_v49  ;;  %792 = vtanh.f32 %v528_v47 }
 0x156   :  { %v623_v51 = vadd.f32 0.5, %v591_v48 }
 0x157   :  { %v791_v52 = vpop.eup %790  ;;  %v543_v53 = vmul.f32 0.5, %v496_v50 }
 0x158   :  { %v606_v54 = vmul.f32 0.5, %v791_v52  ;;  %656 = vst.msk [vmem:[%s1243_s5 + $0x40] sm:$0xff] %vm647_vm1, %v623_v51  ;;  %v453_v55 = vpop.f32.mrf.mxu1 }
 0x159   :  { %794 = vtanh.f32 %v543_v53  ;;  %v454_v56 = vadd.f32 %v1075_v9, %v453_v55 }
 0x15a   :  { %v638_v57 = vadd.f32 0.5, %v606_v54 }
 0x15b   :  { %v793_v58 = vpop.eup %792  ;;  %v529_v59 = vmul.f32 0.5, %v454_v56 }
 0x15c   :  { %671 = vst.msk [vmem:[%s1243_s5 + $0xb8] sm:$0xff] %vm647_vm1, %v638_v57  ;;  %v592_v60 = vmul.f32 0.5, %v793_v58  ;;  %v498_v61 = vpop.f32.mrf.mxu3 }
 0x15d   :  { %v499_v62 = vadd.f32 %v1075_v9, %v498_v61  ;;  %796 = vtanh.f32 %v529_v59 }
 0x15e   :  { %v624_v63 = vadd.f32 0.5, %v592_v60 }
 0x15f   :  { %v795_v0 = vpop.eup %794  ;;  %v544_v1 = vmul.f32 0.5, %v499_v62 }
 0x160   :  { %v607_v2 = vmul.f32 0.5, %v795_v0  ;;  %657 = vst.msk [vmem:[%s1243_s5 + $0x48] sm:$0xff] %vm647_vm1, %v624_v63  ;;  %v456_v3 = vpop.f32.mrf.mxu1 }
 0x161   :  { %798 = vtanh.f32 %v544_v1  ;;  %v457_v4 = vadd.f32 %v1075_v9, %v456_v3 }
 0x162   :  { %v639_v5 = vadd.f32 0.5, %v607_v2 }
 0x163   :  { %v797_v6 = vpop.eup %796  ;;  %v530_v7 = vmul.f32 0.5, %v457_v4 }
 0x164   :  { %672 = vst.msk [vmem:[%s1243_s5 + $0xc0] sm:$0xff] %vm647_vm1, %v639_v5  ;;  %v593_v8 = vmul.f32 0.5, %v797_v6  ;;  %v501_v10 = vpop.f32.mrf.mxu3 }
 0x165   :  { %v502_v11 = vadd.f32 %v1075_v9, %v501_v10  ;;  %800 = vtanh.f32 %v530_v7 }
 0x166   :  { %v625_v12 = vadd.f32 0.5, %v593_v8 }
 0x167   :  { %v799_v13 = vpop.eup %798  ;;  %v545_v14 = vmul.f32 0.5, %v502_v11 }
 0x168   :  { %v608_v15 = vmul.f32 0.5, %v799_v13  ;;  %658 = vst.msk [vmem:[%s1243_s5 + $0x50] sm:$0xff] %vm647_vm1, %v625_v12  ;;  %v459_v16 = vpop.f32.mrf.mxu1 }
 0x169   :  { %802 = vtanh.f32 %v545_v14  ;;  %v460_v17 = vadd.f32 %v1075_v9, %v459_v16 }
 0x16a   :  { %v640_v18 = vadd.f32 0.5, %v608_v15 }
 0x16b   :  { %v801_v40 = vpop.eup %800  ;;  %v531_v19 = vmul.f32 0.5, %v460_v17 }
 0x16c   :  { %673 = vst.msk [vmem:[%s1243_s5 + $0xc8] sm:$0xff] %vm647_vm1, %v640_v18  ;;  %v594_v20 = vmul.f32 0.5, %v801_v40  ;;  %v504_v21 = vpop.f32.mrf.mxu3 }
 0x16d   :  { %v505_v22 = vadd.f32 %v1075_v9, %v504_v21  ;;  %804 = vtanh.f32 %v531_v19 }
 0x16e   :  { %v626_v23 = vadd.f32 0.5, %v594_v20 }
 0x16f   :  { %v803_v24 = vpop.eup %802  ;;  %v546_v25 = vmul.f32 0.5, %v505_v22 }
 0x170   :  { %v609_v26 = vmul.f32 0.5, %v803_v24  ;;  %659 = vst.msk [vmem:[%s1243_s5 + $0x58] sm:$0xff] %vm647_vm1, %v626_v23  ;;  %v462_v27 = vpop.f32.mrf.mxu1 }
 0x171   :  { %806 = vtanh.f32 %v546_v25  ;;  %v463_v28 = vadd.f32 %v1075_v9, %v462_v27 }
 0x172   :  { %v641_v29 = vadd.f32 0.5, %v609_v26 }
 0x173   :  { %v805_v30 = vpop.eup %804  ;;  %v532_v31 = vmul.f32 0.5, %v463_v28 }
 0x174   :  { %674 = vst.msk [vmem:[%s1243_s5 + $0xd0] sm:$0xff] %vm647_vm1, %v641_v29  ;;  %v595_v32 = vmul.f32 0.5, %v805_v30  ;;  %v507_v33 = vpop.f32.mrf.mxu3 }
 0x175   :  { %v508_v34 = vadd.f32 %v1075_v9, %v507_v33  ;;  %808 = vtanh.f32 %v532_v31 }
 0x176   :  { %v627_v35 = vadd.f32 0.5, %v595_v32 }
 0x177   :  { %v807_v36 = vpop.eup %806  ;;  %v547_v37 = vmul.f32 0.5, %v508_v34 }
 0x178   :  { %v610_v38 = vmul.f32 0.5, %v807_v36  ;;  %660 = vst.msk [vmem:[%s1243_s5 + $0x60] sm:$0xff] %vm647_vm1, %v627_v35  ;;  %v465_v39 = vpop.f32.mrf.mxu1 }
 0x179   :  { %810 = vtanh.f32 %v547_v37  ;;  %v466_v41 = vadd.f32 %v1075_v9, %v465_v39 }
 0x17a   :  { %v642_v42 = vadd.f32 0.5, %v610_v38 }
 0x17b   :  { %v809_v43 = vpop.eup %808  ;;  %v533_v44 = vmul.f32 0.5, %v466_v41 }
 0x17c   :  { %675 = vst.msk [vmem:[%s1243_s5 + $0xd8] sm:$0xff] %vm647_vm1, %v642_v42  ;;  %v596_v45 = vmul.f32 0.5, %v809_v43  ;;  %v510_v46 = vpop.f32.mrf.mxu3 }
 0x17d   :  { %v511_v47 = vadd.f32 %v1075_v9, %v510_v46  ;;  %812 = vtanh.f32 %v533_v44 }
 0x17e   :  { %v628_v48 = vadd.f32 0.5, %v596_v45 }
 0x17f   :  { %v811_v49 = vpop.eup %810  ;;  %v548_v50 = vmul.f32 0.5, %v511_v47 }
 0x180   :  { %v611_v51 = vmul.f32 0.5, %v811_v49  ;;  %661 = vst.msk [vmem:[%s1243_s5 + $0x68] sm:$0xff] %vm647_vm1, %v628_v48  ;;  %v468_v52 = vpop.f32.mrf.mxu1 }
 0x181   :  { %814 = vtanh.f32 %v548_v50  ;;  %v469_v53 = vadd.f32 %v1075_v9, %v468_v52 }
 0x182   :  { %v643_v54 = vadd.f32 0.5, %v611_v51 }
 0x183   :  { %v813_v55 = vpop.eup %812  ;;  %v534_v56 = vmul.f32 0.5, %v469_v53 }
 0x184   :  { %676 = vst.msk [vmem:[%s1243_s5 + $0xe0] sm:$0xff] %vm647_vm1, %v643_v54  ;;  %v597_v57 = vmul.f32 0.5, %v813_v55  ;;  %v513_v58 = vpop.f32.mrf.mxu3 }
 0x185   :  { %v514_v59 = vadd.f32 %v1075_v9, %v513_v58  ;;  %816 = vtanh.f32 %v534_v56 }
 0x186   :  { %v629_v60 = vadd.f32 0.5, %v597_v57 }
 0x187   :  { %v815_v61 = vpop.eup %814  ;;  %v549_v62 = vmul.f32 0.5, %v514_v59 }
 0x188   :  { %v612_v63 = vmul.f32 0.5, %v815_v61  ;;  %662 = vst.msk [vmem:[%s1243_s5 + $0x70] sm:$0xff] %vm647_vm1, %v629_v60 }
 0x189   :  { %818 = vtanh.f32 %v549_v62 }
 0x18a   :  { %v644_v0 = vadd.f32 0.5, %v612_v63 }
 0x18b   :  { %v817_v1 = vpop.eup %816 }
 0x18c   :  { %677 = vst.msk [vmem:[%s1243_s5 + $0xe8] sm:$0xff] %vm647_vm1, %v644_v0  ;;  %v598_v2 = vmul.f32 0.5, %v817_v1  ;;  %v516_v3 = vpop.f32.mrf.mxu3 }
 0x18d   :  { %v517_v4 = vadd.f32 %v1075_v9, %v516_v3 }
 0x18e   :  { %v630_v5 = vadd.f32 0.5, %v598_v2 }
 0x18f   :  { %v819_v6 = vpop.eup %818  ;;  %v550_v7 = vmul.f32 0.5, %v517_v4 }
 0x190   :  { %v613_v8 = vmul.f32 0.5, %v819_v6  ;;  %663 = vst.msk [vmem:[%s1243_s5 + $0x78] sm:$0xff] %vm647_vm1, %v630_v5 }
 0x191   :  { %820 = vtanh.f32 %v550_v7 }
 0x192   :  { %v645_v10 = vadd.f32 0.5, %v613_v8 }
 0x194   :  { %678 = vst.msk [vmem:[%s1243_s5 + $0xf0] sm:$0xff] %vm647_vm1, %v645_v10 }
 0x197   :  { %v821_v11 = vpop.eup %820 }
 0x198   :  { %v614_v12 = vmul.f32 0.5, %v821_v11 }
 0x19a   :  { %v646_v13 = vadd.f32 0.5, %v614_v12 }
 0x19c   :  { %679 = vst.msk [vmem:[%s1243_s5 + $0xf8] sm:$0xff] %vm647_vm1, %v646_v13 }

</bundles_post_ra>
